<compile_context>
chip_gen: v6e
topology: v6e:2x2x1
jax: 0.10.0
libtpu: 0.0.40
codegen_flags: <defaults>
</compile_context>

<pallas_src>
import math
import functools

import jax
import jax.numpy as jnp
from jax.experimental import pallas as pl
from jax.experimental.pallas import tpu as pltpu


def _layernorm(x, w, b, eps=1e-5):
    mu = jnp.mean(x, axis=-1, keepdims=True)
    xc = x - mu
    var = jnp.mean(xc * xc, axis=-1, keepdims=True)
    return xc * jax.lax.rsqrt(var + eps) * w + b


def _pick_tile(total, pref, align):
    """Largest tile <= pref that divides `total` and is a multiple of `align`;
    falls back to the full extent (always a legal block shape)."""
    if total <= pref:
        return total
    t = (pref // align) * align
    while t >= align:
        if total % t == 0:
            return t
        t -= align
    return total


# --------------------- kernel 1: LN1 + QKV projection -----------------------
def qkv_kernel(x_ref, ln1w_ref, ln1b_ref, qkvw_ref, q_ref, k_ref, v_ref):
    x = x_ref[0]                                            # (TN, C) f32
    C = x.shape[-1]
    xn = _layernorm(x, ln1w_ref[...], ln1b_ref[...])
    qkv = jnp.dot(xn.astype(qkvw_ref.dtype), qkvw_ref[...],
                  preferred_element_type=jnp.float32)       # (TN, 3C) f32 acc
    q_ref[0] = qkv[:, 0 * C:1 * C].astype(q_ref.dtype)      # scale pre-folded
    k_ref[0] = qkv[:, 1 * C:2 * C].astype(k_ref.dtype)
    v_ref[0] = qkv[:, 2 * C:3 * C].astype(v_ref.dtype)


# ------------------ kernel 2: flash attention per (B, head) -----------------
def flash_attn_kernel(q_ref, k_ref, v_ref, o_ref, m_sc, l_sc, acc_sc):
    ki = pl.program_id(3)

    @pl.when(ki == 0)
    def _():
        m_sc[...] = jnp.full_like(m_sc, -jnp.inf)
        l_sc[...] = jnp.zeros_like(l_sc)
        acc_sc[...] = jnp.zeros_like(acc_sc)

    q = q_ref[0, 0]                                         # (TQ, hd) bf16
    k = k_ref[0, 0]                                         # (TK, hd) bf16
    v = v_ref[0, 0]                                         # (TK, hd) bf16
    s = jax.lax.dot_general(q, k, (((1,), (1,)), ((), ())),
                            preferred_element_type=jnp.float32)   # (TQ, TK)

    m_prev = m_sc[...]
    m_new = jnp.maximum(m_prev, jnp.max(s, axis=-1, keepdims=True))
    alpha = jnp.exp(m_prev - m_new)
    p = jnp.exp(s - m_new)
    l_sc[...] = alpha * l_sc[...] + jnp.sum(p, axis=-1, keepdims=True)
    acc_sc[...] = alpha * acc_sc[...] + jnp.dot(
        p.astype(v.dtype), v, preferred_element_type=jnp.float32)
    m_sc[...] = m_new

    @pl.when(ki == pl.num_programs(3) - 1)
    def _():
        inv_l = pl.reciprocal(l_sc[...], approx=True)
        o_ref[0, 0] = (acc_sc[...] * inv_l).astype(o_ref.dtype)


# ------- kernel 3: out-proj + residual + LN2 + MLP (hidden K-tiled) ---------
def proj_mlp_kernel(x_ref, a_ref, projw_ref, projb_ref,
                    ln2w_ref, ln2b_ref, fc1w_ref, fc1b_ref,
                    fc2w_ref, fc2b_ref, o_ref,
                    x1_sc, xn2_sc, acc_sc):
    hk = pl.program_id(2)

    @pl.when(hk == 0)
    def _():
        x = x_ref[0]                                        # (TN, C) f32
        a = a_ref[0]                                        # (TN, C) bf16 heads-merged
        proj = jnp.dot(a, projw_ref[...],
                       preferred_element_type=jnp.float32) + projb_ref[...]
        x1 = x + proj                                       # residual 1
        x1_sc[...] = x1
        xn2_sc[...] = _layernorm(x1, ln2w_ref[...],
                                 ln2b_ref[...]).astype(xn2_sc.dtype)
        acc_sc[...] = jnp.zeros_like(acc_sc)

    # one hidden-dim tile of the MLP
    h1 = jnp.dot(xn2_sc[...], fc1w_ref[...],
                 preferred_element_type=jnp.float32) + fc1b_ref[...]
    h1 = jax.nn.gelu(h1, approximate=False)                 # exact erf == nn.GELU()
    acc_sc[...] += jnp.dot(h1.astype(fc2w_ref.dtype), fc2w_ref[...],
                           preferred_element_type=jnp.float32)

    @pl.when(hk == pl.num_programs(2) - 1)
    def _():
        o_ref[0] = (x1_sc[...] + acc_sc[...] + fc2b_ref[...]).astype(o_ref.dtype)


# --------------------------------- wrapper ----------------------------------
def transformer_encoder_layer(x, params, num_heads, H=None, W=None):
    # TODO(synk): H, W unused — vanilla (non-PVT) attention/MLP assumed.
    del H, W
    B, N, C = x.shape
    assert C % num_heads == 0
    hd = C // num_heads
    hidden = params["fc1_w"].shape[1]
    f32, bf16 = jnp.float32, jnp.bfloat16

    TN = _pick_tile(N, 256, 8)          # token tile for QKV / proj+MLP
    TQ = _pick_tile(N, 256, 8)          # flash-attention query tile
    TK = _pick_tile(N, 512, 8)          # flash-attention kv tile
    TH = _pick_tile(hidden, 512, 128)   # MLP hidden K-tile

    # ---- 1) LN1 + QKV projection (token-tiled, bf16 matmul) ----------------
    q, k, v = pl.pallas_call(
        qkv_kernel,
        out_shape=(jax.ShapeDtypeStruct((B, N, C), bf16),) * 3,
        grid_spec=pltpu.PrefetchScalarGridSpec(
            num_scalar_prefetch=0,
            grid=(B, N // TN),
            in_specs=[
                pl.BlockSpec((1, TN, C), lambda b, t: (b, t, 0)),
                pl.BlockSpec((1, C), lambda b, t: (0, 0)),
                pl.BlockSpec((1, C), lambda b, t: (0, 0)),
                pl.BlockSpec((C, 3 * C), lambda b, t: (0, 0)),
            ],
            out_specs=[pl.BlockSpec((1, TN, C), lambda b, t: (b, t, 0))] * 3,
        ),
        compiler_params=pltpu.CompilerParams(
            dimension_semantics=("parallel", "parallel")),
    )(x, params["ln1_w"], params["ln1_b"], params["qkv_w"])

    # layout plumbing (XLA): (B, N, C) -> (B, heads, N, hd)
    def to_heads(t):
        return t.reshape(B, N, num_heads, hd).transpose(0, 2, 1, 3)
    qh, kh, vh = to_heads(q), to_heads(k), to_heads(v)

    # ---- 2) flash attention: grid (B, heads, q-tiles, kv-tiles) ------------
    attn = pl.pallas_call(
        flash_attn_kernel,
        out_shape=jax.ShapeDtypeStruct((B, num_heads, N, hd), bf16),
        grid_spec=pltpu.PrefetchScalarGridSpec(
            num_scalar_prefetch=0,
            grid=(B, num_heads, N // TQ, N // TK),
            in_specs=[
                pl.BlockSpec((1, 1, TQ, hd), lambda b, h, qi, ki: (b, h, qi, 0)),
                pl.BlockSpec((1, 1, TK, hd), lambda b, h, qi, ki: (b, h, ki, 0)),
                pl.BlockSpec((1, 1, TK, hd), lambda b, h, qi, ki: (b, h, ki, 0)),
            ],
            out_specs=pl.BlockSpec((1, 1, TQ, hd),
                                   lambda b, h, qi, ki: (b, h, qi, 0)),
            scratch_shapes=[
                pltpu.VMEM((TQ, 1), f32),      # running max
                pltpu.VMEM((TQ, 1), f32),      # running denom
                pltpu.VMEM((TQ, hd), f32),     # output accumulator
            ],
        ),
        compiler_params=pltpu.CompilerParams(
            dimension_semantics=("parallel", "parallel", "parallel", "arbitrary")),
    )(qh, kh, vh)

    # merge heads back to a lane-dense (B, N, C) slab
    attn = attn.transpose(0, 2, 1, 3).reshape(B, N, C)

    # ---- 3) out-proj + residual + LN2 + MLP (hidden K-tiled) + residual ----
    out = pl.pallas_call(
        proj_mlp_kernel,
        out_shape=jax.ShapeDtypeStruct((B, N, C), x.dtype),
        grid_spec=pltpu.PrefetchScalarGridSpec(
            num_scalar_prefetch=0,
            grid=(B, N // TN, hidden // TH),
            in_specs=[
                pl.BlockSpec((1, TN, C), lambda b, t, hk: (b, t, 0)),   # x
                pl.BlockSpec((1, TN, C), lambda b, t, hk: (b, t, 0)),   # attn
                pl.BlockSpec((C, C), lambda b, t, hk: (0, 0)),          # proj_w
                pl.BlockSpec((1, C), lambda b, t, hk: (0, 0)),          # proj_b
                pl.BlockSpec((1, C), lambda b, t, hk: (0, 0)),          # ln2_w
                pl.BlockSpec((1, C), lambda b, t, hk: (0, 0)),          # ln2_b
                pl.BlockSpec((C, TH), lambda b, t, hk: (0, hk)),        # fc1_w
                pl.BlockSpec((1, TH), lambda b, t, hk: (0, hk)),        # fc1_b
                pl.BlockSpec((TH, C), lambda b, t, hk: (hk, 0)),        # fc2_w
                pl.BlockSpec((1, C), lambda b, t, hk: (0, 0)),          # fc2_b
            ],
            out_specs=pl.BlockSpec((1, TN, C), lambda b, t, hk: (b, t, 0)),
            scratch_shapes=[
                pltpu.VMEM((TN, C), f32),    # x1 (residual-1 result)
                pltpu.VMEM((TN, C), bf16),   # LN2(x1), matmul-ready
                pltpu.VMEM((TN, C), f32),    # fc2 accumulator
            ],
        ),
        compiler_params=pltpu.CompilerParams(
            dimension_semantics=("parallel", "parallel", "arbitrary")),
    )(x, attn,
      params["proj_w"], params["proj_b"],
      params["ln2_w"], params["ln2_b"],
      params["fc1_w"], params["fc1_b"],
      params["fc2_w"], params["fc2_b"])
    return out


# ----------------------- parameter prep / reference -------------------------
def make_params(key, dim, mlp_ratio):
    hidden = int(dim * mlp_ratio)
    ks = jax.random.split(key, 4)
    std = 0.02   # trunc_normal_(std=0.02) -> effectively N(0, 0.02)
    f32 = jnp.float32
    return {
        "ln1_w": jnp.ones((1, dim), f32),
        "ln1_b": jnp.zeros((1, dim), f32),
        "qkv_w": std * jax.random.normal(ks[0], (dim, 3 * dim), f32),
        "proj_w": std * jax.random.normal(ks[1], (dim, dim), f32),
        "proj_b": jnp.zeros((1, dim), f32),
        "ln2_w": jnp.ones((1, dim), f32),
        "ln2_b": jnp.zeros((1, dim), f32),
        "fc1_w": std * jax.random.normal(ks[2], (dim, hidden), f32),
        "fc1_b": jnp.zeros((1, hidden), f32),
        "fc2_w": std * jax.random.normal(ks[3], (hidden, dim), f32),
        "fc2_b": jnp.zeros((1, dim), f32),
    }


def prepare_params(params, num_heads):
    """Offline transform: fold 1/sqrt(hd) into Q columns, cast matmul weights
    to bf16 (f32 accumulation happens in-kernel); keep LN/bias params in f32."""
    C = params["qkv_w"].shape[0]
    hd = C // num_heads
    scale = hd ** -0.5
    qkv_w = params["qkv_w"].at[:, :C].multiply(scale)
    bf16 = jnp.bfloat16
    p = dict(params)
    p["qkv_w"] = qkv_w.astype(bf16)
    p["proj_w"] = params["proj_w"].astype(bf16)
    p["fc1_w"] = params["fc1_w"].astype(bf16)
    p["fc2_w"] = params["fc2_w"].astype(bf16)
    return p


def reference(x, params, num_heads):
    B, N, C = x.shape
    hd = C // num_heads
    scale = hd ** -0.5

    def ln(z, w, b):
        mu = jnp.mean(z, -1, keepdims=True)
        var = jnp.mean((z - mu) ** 2, -1, keepdims=True)
        return (z - mu) / jnp.sqrt(var + 1e-5) * w + b

    xn = ln(x, params["ln1_w"], params["ln1_b"])
    qkv = xn @ params["qkv_w"]
    q, k, v = jnp.split(qkv, 3, axis=-1)
    q = q.reshape(B, N, num_heads, hd).transpose(0, 2, 1, 3)
    k = k.reshape(B, N, num_heads, hd).transpose(0, 2, 1, 3)
    v = v.reshape(B, N, num_heads, hd).transpose(0, 2, 1, 3)
    s = jnp.einsum("bhqd,bhkd->bhqk", q, k) * scale
    p = jax.nn.softmax(s, axis=-1)
    o = jnp.einsum("bhqk,bhkd->bhqd", p, v).transpose(0, 2, 1, 3).reshape(B, N, C)
    o = o @ params["proj_w"] + params["proj_b"]
    x1 = x + o
    xn2 = ln(x1, params["ln2_w"], params["ln2_b"])
    h = jax.nn.gelu(xn2 @ params["fc1_w"] + params["fc1_b"], approximate=False)
    return x1 + (h @ params["fc2_w"] + params["fc2_b"])


if __name__ == "__main__":
    B, H, W, dim, num_heads, mlp_ratio = 2, 4, 4, 32, 4, 4.0
    N = H * W

    key = jax.random.PRNGKey(0)
    kx, kp = jax.random.split(key)
    x = jax.random.normal(kx, (B, N, dim), jnp.float32)
    params = make_params(kp, dim, mlp_ratio)
    prepared = prepare_params(params, num_heads)

    out = transformer_encoder_layer(x, prepared, num_heads, H, W)
    out = jax.block_until_ready(out)

    ref = reference(x, params, num_heads)
    err = jnp.max(jnp.abs(out - ref))
    assert out.shape == (B, N, dim)
    assert jnp.allclose(out, ref, atol=1e-2, rtol=1e-2), f"max abs err {err}"
    print("KERNEL_OK")
</pallas_src>

<mosaic_0001>
module attributes {stable_mosaic.version = 11 : i64} {
  func.func @qkv_kernel(%arg0: i32, %arg1: i32, %arg2: memref<1x16x32xf32, #tpu.memory_space<vmem>>, %arg3: memref<1x32xf32, #tpu.memory_space<vmem>>, %arg4: memref<1x32xf32, #tpu.memory_space<vmem>>, %arg5: memref<32x96xbf16, #tpu.memory_space<vmem>>, %arg6: memref<1x16x32xbf16, #tpu.memory_space<vmem>>, %arg7: memref<1x16x32xbf16, #tpu.memory_space<vmem>>, %arg8: memref<1x16x32xbf16, #tpu.memory_space<vmem>>) attributes {dimension_semantics = [#tpu.dimension_semantics<parallel>, #tpu.dimension_semantics<parallel>], iteration_bounds = array<i64: 2, 1>, scalar_prefetch = 0 : i64, scratch_operands = 0 : i64, tpu.core_type = #tpu.core_type<tc>, window_params = [{transform_indices = @transform_0, window_bounds = array<i64: 1, 16, 32>}, {pipeline_mode = #tpu.pipeline_mode<synchronous>, transform_indices = @transform_1, window_bounds = array<i64: 1, 32>}, {pipeline_mode = #tpu.pipeline_mode<synchronous>, transform_indices = @transform_2, window_bounds = array<i64: 1, 32>}, {pipeline_mode = #tpu.pipeline_mode<synchronous>, transform_indices = @transform_3, window_bounds = array<i64: 32, 96>}, {transform_indices = @transform_4, window_bounds = array<i64: 1, 16, 32>}, {transform_indices = @transform_5, window_bounds = array<i64: 1, 16, 32>}, {transform_indices = @transform_6, window_bounds = array<i64: 1, 16, 32>}]} {
    %c0 = arith.constant 0 : index
    %c0_0 = arith.constant 0 : index
    %c0_1 = arith.constant 0 : index
    %0 = vector.load %arg2[%c0, %c0_0, %c0_1] : memref<1x16x32xf32, #tpu.memory_space<vmem>>, vector<1x16x32xf32>
    %1 = vector.shape_cast %0 : vector<1x16x32xf32> to vector<16x32xf32>
    %c0_2 = arith.constant 0 : index
    %c0_3 = arith.constant 0 : index
    %2 = vector.load %arg3[%c0_2, %c0_3] : memref<1x32xf32, #tpu.memory_space<vmem>>, vector<1x32xf32>
    %c0_4 = arith.constant 0 : index
    %c0_5 = arith.constant 0 : index
    %3 = vector.load %arg4[%c0_4, %c0_5] : memref<1x32xf32, #tpu.memory_space<vmem>>, vector<1x32xf32>
    %cst = arith.constant dense<0.000000e+00> : vector<16xf32>
    %4 = vector.multi_reduction <add>, %1, %cst [1] : vector<16x32xf32> to vector<16xf32>
    %5 = vector.shape_cast %4 : vector<16xf32> to vector<16x1xf32>
    %cst_6 = arith.constant 3.200000e+01 : f32
    %6 = vector.broadcast %cst_6 : f32 to vector<16x1xf32>
    %7 = arith.divf %5, %6 : vector<16x1xf32>
    %8 = vector.broadcast %7 : vector<16x1xf32> to vector<16x32xf32>
    %9 = arith.subf %1, %8 : vector<16x32xf32>
    %10 = arith.mulf %9, %9 : vector<16x32xf32>
    %cst_7 = arith.constant dense<0.000000e+00> : vector<16xf32>
    %11 = vector.multi_reduction <add>, %10, %cst_7 [1] : vector<16x32xf32> to vector<16xf32>
    %12 = vector.shape_cast %11 : vector<16xf32> to vector<16x1xf32>
    %cst_8 = arith.constant 3.200000e+01 : f32
    %13 = vector.broadcast %cst_8 : f32 to vector<16x1xf32>
    %14 = arith.divf %12, %13 : vector<16x1xf32>
    %cst_9 = arith.constant 9.99999974E-6 : f32
    %15 = vector.broadcast %cst_9 : f32 to vector<16x1xf32>
    %16 = arith.addf %14, %15 : vector<16x1xf32>
    %17 = math.rsqrt %16 : vector<16x1xf32>
    %18 = vector.broadcast %17 : vector<16x1xf32> to vector<16x32xf32>
    %19 = arith.mulf %9, %18 : vector<16x32xf32>
    %20 = vector.broadcast %2 : vector<1x32xf32> to vector<16x32xf32>
    %21 = arith.mulf %19, %20 : vector<16x32xf32>
    %22 = vector.broadcast %3 : vector<1x32xf32> to vector<16x32xf32>
    %23 = arith.addf %21, %22 : vector<16x32xf32>
    %24 = arith.truncf %23 : vector<16x32xf32> to vector<16x32xbf16>
    %c0_10 = arith.constant 0 : index
    %c0_11 = arith.constant 0 : index
    %25 = vector.load %arg5[%c0_10, %c0_11] : memref<32x96xbf16, #tpu.memory_space<vmem>>, vector<32x96xbf16>
    %cst_12 = arith.constant dense<0.000000e+00> : vector<16x96xf32>
    %26 = tpu.matmul %24, %25, %cst_12 {dimension_numbers = #tpu.dot_dimension_numbers<[1], [0], [0], [1], [0, 0, 1, 1], [], []>} : vector<16x32xbf16>, vector<32x96xbf16>, vector<16x96xf32> -> vector<16x96xf32>
    %27 = vector.extract_strided_slice %26 {offsets = [0, 0], sizes = [16, 32], strides = [1, 1]} : vector<16x96xf32> to vector<16x32xf32>
    %28 = arith.truncf %27 : vector<16x32xf32> to vector<16x32xbf16>
    %c0_13 = arith.constant 0 : index
    %c0_14 = arith.constant 0 : index
    %c0_15 = arith.constant 0 : index
    %29 = vector.load %arg6[%c0_13, %c0_14, %c0_15] : memref<1x16x32xbf16, #tpu.memory_space<vmem>>, vector<1x16x32xbf16>
    %30 = vector.shape_cast %29 : vector<1x16x32xbf16> to vector<16x32xbf16>
    %31 = vector.shape_cast %28 : vector<16x32xbf16> to vector<1x16x32xbf16>
    tpu.vector_store %arg6[%c0_13, %c0_14, %c0_15], %31 {strides = array<i32>} : memref<1x16x32xbf16, #tpu.memory_space<vmem>>, vector<1x16x32xbf16>,
    %32 = vector.extract_strided_slice %26 {offsets = [0, 32], sizes = [16, 32], strides = [1, 1]} : vector<16x96xf32> to vector<16x32xf32>
    %33 = arith.truncf %32 : vector<16x32xf32> to vector<16x32xbf16>
    %c0_16 = arith.constant 0 : index
    %c0_17 = arith.constant 0 : index
    %c0_18 = arith.constant 0 : index
    %34 = vector.load %arg7[%c0_16, %c0_17, %c0_18] : memref<1x16x32xbf16, #tpu.memory_space<vmem>>, vector<1x16x32xbf16>
    %35 = vector.shape_cast %34 : vector<1x16x32xbf16> to vector<16x32xbf16>
    %36 = vector.shape_cast %33 : vector<16x32xbf16> to vector<1x16x32xbf16>
    tpu.vector_store %arg7[%c0_16, %c0_17, %c0_18], %36 {strides = array<i32>} : memref<1x16x32xbf16, #tpu.memory_space<vmem>>, vector<1x16x32xbf16>,
    %37 = vector.extract_strided_slice %26 {offsets = [0, 64], sizes = [16, 32], strides = [1, 1]} : vector<16x96xf32> to vector<16x32xf32>
    %38 = arith.truncf %37 : vector<16x32xf32> to vector<16x32xbf16>
    %c0_19 = arith.constant 0 : index
    %c0_20 = arith.constant 0 : index
    %c0_21 = arith.constant 0 : index
    %39 = vector.load %arg8[%c0_19, %c0_20, %c0_21] : memref<1x16x32xbf16, #tpu.memory_space<vmem>>, vector<1x16x32xbf16>
    %40 = vector.shape_cast %39 : vector<1x16x32xbf16> to vector<16x32xbf16>
    %41 = vector.shape_cast %38 : vector<16x32xbf16> to vector<1x16x32xbf16>
    tpu.vector_store %arg8[%c0_19, %c0_20, %c0_21], %41 {strides = array<i32>} : memref<1x16x32xbf16, #tpu.memory_space<vmem>>, vector<1x16x32xbf16>,
    return
  }
  func.func @transform_0(%arg0: i32, %arg1: i32) -> (i32, i32, i32) {
    %c0_i32 = arith.constant 0 : i32
    %c0_i32_0 = arith.constant 0 : i32
    return %arg0, %arg1, %c0_i32 : i32, i32, i32
  }
  func.func @transform_1(%arg0: i32, %arg1: i32) -> (i32, i32) {
    %c0_i32 = arith.constant 0 : i32
    %c0_i32_0 = arith.constant 0 : i32
    %c0_i32_1 = arith.constant 0 : i32
    return %c0_i32, %c0_i32_0 : i32, i32
  }
  func.func @transform_2(%arg0: i32, %arg1: i32) -> (i32, i32) {
    %c0_i32 = arith.constant 0 : i32
    %c0_i32_0 = arith.constant 0 : i32
    %c0_i32_1 = arith.constant 0 : i32
    return %c0_i32, %c0_i32_0 : i32, i32
  }
  func.func @transform_3(%arg0: i32, %arg1: i32) -> (i32, i32) {
    %c0_i32 = arith.constant 0 : i32
    %c0_i32_0 = arith.constant 0 : i32
    %c0_i32_1 = arith.constant 0 : i32
    return %c0_i32, %c0_i32_0 : i32, i32
  }
  func.func @transform_4(%arg0: i32, %arg1: i32) -> (i32, i32, i32) {
    %c0_i32 = arith.constant 0 : i32
    %c0_i32_0 = arith.constant 0 : i32
    return %arg0, %arg1, %c0_i32 : i32, i32, i32
  }
  func.func @transform_5(%arg0: i32, %arg1: i32) -> (i32, i32, i32) {
    %c0_i32 = arith.constant 0 : i32
    %c0_i32_0 = arith.constant 0 : i32
    return %arg0, %arg1, %c0_i32 : i32, i32, i32
  }
  func.func @transform_6(%arg0: i32, %arg1: i32) -> (i32, i32, i32) {
    %c0_i32 = arith.constant 0 : i32
    %c0_i32_0 = arith.constant 0 : i32
    return %arg0, %arg1, %c0_i32 : i32, i32, i32
  }
}

</mosaic_0001>

<bundles_post_ra>
// kernel: tpu_custom_call.1
= control target key start
LH: loop header
LB: loop body
LE: loop exit
PB: predicated region body
PF: predicated region fallthrough
CT: control target
= control target key end

     0   :  { %s1370_s0 = inlined_call_operand.hbm [shape: f32[2,16,32], index: 0, kind: input, shape index: {}]   ;;  %s1371_s1 = inlined_call_operand.vmem [shape: f32[1,32], index: 1, kind: input, shape index: {}]   ;;  %s1372_s2 = inlined_call_operand.vmem [shape: f32[1,32], index: 2, kind: input, shape index: {}]   ;;  %s1373_s3 = inlined_call_operand.hbm [shape: bf16[32,96], index: 3, kind: input, shape index: {}]   ;;  %s1374_s4 = inlined_call_operand.hbm [shape: bf16[2,16,32], index: 4, kind: output, shape index: {0}]   ;;  %s1375_s5 = inlined_call_operand.hbm [shape: bf16[2,16,32], index: 5, kind: output, shape index: {1}]   ;;  %s1376_s6 = inlined_call_operand.hbm [shape: bf16[2,16,32], index: 6, kind: output, shape index: {2}]  }
   0x1   :  { %1381 = sst [smem:[#allocation17_spill]] %s1373_s3 }
   0x2   :  { %12 = vsyncpa [#allocation3], 0 }
   0x3   :  { %14 = vsyncpa [#allocation3 + $0x1], 0 }
   0x4   :  { %15 = vsyncpa [#allocation6], 0 }
   0x5   :  { %16 = vsyncpa [#allocation4], 0 }
   0x6   :  { %18 = vsyncpa [#allocation4 + $0x1], 0 }
   0x7   :  { %19 = vsyncpa [#allocation9], 0 }
   0x8   :  { %21 = vsyncpa [#allocation9 + $0x1], 0  ;;  %s1084_s21 = smov 0   ;;  %s1086_s22 = smov 0  }
   0x9   :  { %s1088_s23 = smov 0   ;;  %s1090_s24 = smov 0  }
   0xa   :  { %s1092_s25 = smov 0   ;;  %s1094_s26 = smov 0  }
   0xb LB: > { %1382 = sst [smem:[#allocation15_spill]] %s1029_s25  ;;  %s1115_s27 = sadd.s32 4294967295, %s1033_s26   ;;  %s1033_s26 = sphi %s1094_s26, %s27_s26   ;;  %s1029_s25 = sphi %s1092_s25, %s1399_s25   ;;  %s1025_s24 = sphi %s1090_s24, %s1398_s24   ;;  %s1021_s23 = sphi %s1088_s23, %s1402_s23   ;;  %s1017_s22 = sphi %s1086_s22, %s1401_s22   ;;  %s1013_s21 = sphi %s1084_s21, %s1400_s21  }
   0xc   : > { %s1377_s28 = sadd.s32 4294967294, %s1033_s26   ;;  %p61_p0 = scmp.ne.s32.totalorder %s1017_s22, %s1013_s21 }
   0xd   : > { %p1380_p1 = scmp.eq.s32.totalorder %s1115_s27, 0  ;;  %p156_p3 = scmp.eq.s32.totalorder %s1377_s28, 1 }
   0xe   : > { %p694_p5 = scmp.ge.s32.totalorder %s1033_s26, 1  ;;  %p219_p7 = scmp.lt.s32.totalorder %s1033_s26, 3 }
   0xf   : > { %p1126_p4 = por %p1380_p1, %p61_p0  ;;  %p1131_p6 = por %p156_p3, %p61_p0 }
  0x10   : > { %p1136_p8 = pnand %p694_p5, %p219_p7  ;;  %s1035_s8 = smov [#allocation5]  }
  0x11   : > { %s1384_s30 = scalar_select %p1131_p6, 1, 0 }
  0x12   : > { %s237_s9 = sshll.u32 %s1035_s8, 4  ;;  %p753_p9 = pneg %p1136_p8  ;;  %s238_s9 = int_to_ptr.vmem [resolvable:$true] %s237_s9 }
  0x13   : > { %s39_s11 = sadd.s32 1, %s1029_s25  ;;  %s850_s12 = scalar_lea.vmem %s238_s9, 256 }
  0x14   : > { %p1145_p11 = pnand %p753_p9, %p1380_p1  ;;  %p851_p13 = scmp.ne.s32.totalorder %s238_s9, %s850_s12 }
  0x15   : > { %p858_p5 = scmp.lt.s32.totalorder %s238_s9, %s238_s9  ;;  %p859_p7 = scmp.lt.s32.totalorder %s850_s12, %s850_s12 }
  0x16   : > { %p841_p12 = pneg %p1145_p11 }
  0x17   : > { %p860_p2 = por %p859_p7, %p858_p5 }
  0x18   : > { %p853_p0 = pnand %p851_p13, %p841_p12 }
  0x1a   : > { %p854_p3 = pneg %p853_p0 }
  0x1c   : > { %p861_p6 = pnand %p860_p2, %p854_p3 }
  0x1e   : > { %864 = shalt.err (!%p861_p6)
}
  0x1f   : > { %s1036_s13 = smov 64   ;;  %s1037_s14 = smov 4  }
  0x20   : > { %s1387_s3 = sld [smem:[#allocation17_spill]]  ;;  %p41_p2 = scmp.ge.s32.totalorder %s39_s11, 2 }
  0x21   : > { %s48_s17 = sadd.s32 1, %s1021_s23  ;;  %p55_p6 = scmp.ne.s32.totalorder %s1021_s23, %s1017_s22 }
  0x22   : > { %p56_p9 = scmp.eq.s32.totalorder %s1033_s26, 0  ;;  %s1404_s11 = smov (%p41_p2, %s39_s11), 0 }
  0x23   : > { %1388 = sst [smem:[#allocation16_spill]] %s1404_s11  ;;  %p1390_p13 = scmp.eq.s32.totalorder %s1115_s27, 1 }
  0x24   : > { %p1163_p12 = por %p56_p9, %p55_p6  ;;  %s43_s20 = ssub.s32 %s1029_s25, %s1404_s11 }
  0x25   : > { %p1169_p0 = por %p1390_p13, %p55_p6  ;;  %p772_p3 = scmp.lt.s32.totalorder %s1033_s26, 2 }
  0x26   : > { %756 = dma.hbm_to_vmem [thread:$0]  (!%p1145_p11), %s1387_s3, 256, %s238_s9, [#allocation6], %s1036_s13, %s1036_s13, %s1037_s14  }
  0x27   : > { %p46_p11 = scmp.eq.s32.totalorder %s43_s20, 0  ;;  %s251_s8 = sand.u32 1, %s1021_s23  }
  0x28   : > { %s697_s9 = sshll.u32 %s251_s8, 4  ;;  %s724_s12 = sshll.u32 %s1029_s25, 8 }
  0x29   : > { %s1178_s10 = scalar_select %p46_p11, %s1021_s23, %s48_s17  }
  0x2a   : > { %s263_s15 = scalar_lea.hbm %s1370_s0, %s724_s12  ;;  %s255_s16 = scalar_lea.vmem [#allocation2], %s697_s9 }
  0x2b   : > { %s264_s28 = sshll.u32 %s255_s16, 4  ;;  %p1186_p5 = pnand %p772_p3, %p1163_p12  ;;  %s265_s28 = int_to_ptr.vmem [resolvable:$true] %s264_s28 }
  0x2c   : > { %s252_s11 = scalar_lea.sflag [#allocation3], %s251_s8  ;;  %s878_s20 = scalar_lea.vmem %s265_s28, 256 }
  0x2d   : > { %p867_p7 = pneg %p1186_p5  ;;  %p879_p2 = scmp.ne.s32.totalorder %s265_s28, %s878_s20 }
  0x2e   : > { %s1038_s17 = smov [#allocation2]  }
  0x2f   : > { %p881_p6 = pnand %p879_p2, %p867_p7  ;;  %s883_s25 = sshll.u32 %s1038_s17, 4  ;;  %s884_s25 = int_to_ptr.vmem [resolvable:$false] %s883_s25 }
  0x30   : > { %s885_s12 = scalar_lea.vmem %s884_s25, 512  ;;  %p886_p13 = scmp.lt.s32.totalorder %s265_s28, %s884_s25 }
  0x31   : > { %p882_p9 = pneg %p881_p6  ;;  %p887_p11 = scmp.lt.s32.totalorder %s885_s12, %s878_s20 }
  0x33   : > { %p888_p10 = por %p887_p11, %p886_p13 }
  0x35   : > { %p889_p1 = pnand %p888_p10, %p882_p9 }
  0x37   : > { %892 = shalt.err (!%p889_p1)
}
  0x38   : > { %s1039_s18 = smov 128   ;;  %s1040_s9 = smov 8  }
  0x39   : > { %760 = dma.hbm_to_vmem [thread:$0]  (!%p1186_p5), %s263_s15, 256, %s265_s28, %s252_s11, %s1039_s18, %s1039_s18, %s1040_s9  }
  0x3a   : > { %276 = sbr.rel (%p1136_p8) target bundleno = 731 (0x2db), region = 36  ;;  %s1197_s8 = sand.u32 (!%p1136_p8), 1, %s1017_s22  }
  0x3b   : > { %s701_s13 = sshll.u32 (!%p1136_p8), %s1197_s8, 4  ;;  %s279_s25 = scalar_lea.sflag (!%p1136_p8), [#allocation3], %s1197_s8 }
  0x3c   : > { %s282_s14 = scalar_lea.vmem (!%p1136_p8), [#allocation2], %s701_s13 }
  0x3f   : > { %996 = dma.done.wait (%p1126_p4), %s279_s25, 256  }
  0x40   : > { %998 = vsyncadd (%p1126_p4), %s279_s25, 4294967040  ;;  %p1393_p1 = scmp.eq.s32.totalorder %s1115_s27, 0 }
  0x42   : > { %1000 = dma.done.wait (%p1393_p1), [#allocation6], 256   ;;  %p1394_p10 = pmov %p1393_p1 }
  0x43   : > { %vm334_vm0 = vcmask 261120   ;;  %v330_v0 = vld [vmem:[%s282_s14] sm:$0xff]  ;;  %v331_v1 = vld [vmem:[%s282_s14 + $0x8] sm:$0xff]  ;;  %v1041_v15 = vmov 0.0   ;;  %vm1042_vm1 = vmmov 0   ;;  %s1221_s11 = sshll.u32 %s1197_s8, 3 }
  0x44   : > { %1002 = vsyncadd (%p1394_p10), [#allocation6], 4294967040  ;;  %v335_v2 = vsel %vm334_vm0, %v330_v0, 0.0  ;;  %v338_v3 = vsel %vm334_vm0, %v331_v1, 0.0  ;;  %v833_v14 = vld [vmem:[#allocation5 + $0x8] sm:$0xff]   ;;  %733 = vmatprep.subr.bf16.mxu0 %v1041_v15  ;;  %737 = vmatprep.mubr.msk.bf16.mxu0 %vm1042_vm1, %v1041_v15  ;;  %v834_v16 = vld [vmem:[#allocation5] sm:$0xff]  }
  0x45   : > { %336 = vadd.xlane.f32.xlu0 %v335_v2  ;;  %734 = vmatpush3.bf16.msra.mxu0 %v833_v14  ;;  %v706_v25 = vld [vmem:[%s1371_s1] ss:$0 sm:$0xff]  ;;  %vm447_vm2 = vcmask 257024   ;;  %s310_s15 = scalar_lea.vmem [#allocation7], %s1221_s11  ;;  %s1225_s20 = sshll.u32 %s1025_s24, 7 }
  0x46   : > { %735 = vmatprep.subr.bf16.mxu0 %v1041_v15  ;;  %v707_v29 = vld [vmem:[%s1372_s2] ss:$0 sm:$0xff]  ;;  %s492_s16 = sshll.u32 %s310_s15, 4  ;;  %s1043_s17 = smov 64   ;;  %s1229_s16 = int_to_ptr.vmem [resolvable:$true] %s492_s16 }
  0x47   : > { %s1044_s12 = smov 96   ;;  %s1235_s24 = scalar_lea.hbm %s1374_s4, %s1225_s20 }
  0x48   : > { %s467_s13 = scalar_lea.sflag [#allocation4], %s1197_s8  ;;  %s893_s25 = scalar_lea.vmem %s1229_s16, 128 }
  0x49   : > { %339 = vadd.xlane.f32.xlu0 %v338_v3  ;;  %736 = vmatpush3.bf16.msra.mxu0 %v834_v16  ;;  %p894_p4 = scmp.ne.s32.totalorder %s1229_s16, %s893_s25  ;;  %s1045_s14 = smov [#allocation7]  }
  0x4a   : > { %s897_s3 = sshll.u32 %s1045_s14, 4  ;;  %s898_s3 = int_to_ptr.vmem [resolvable:$false] %s897_s3 }
  0x4b   : > { %p895_p8 = pnand %p894_p4, %p1169_p0  ;;  %s899_s28 = scalar_lea.vmem %s898_s3, 256 }
  0x4c   : > { %p900_p3 = scmp.lt.s32.totalorder %s1229_s16, %s898_s3  ;;  %p901_p5 = scmp.lt.s32.totalorder %s899_s28, %s893_s25 }
  0x4d   : > { %p896_p12 = pneg %p895_p8 }
  0x4e   : > { %p902_p7 = por %p901_p5, %p900_p3 }
  0x50   : > { %p903_p2 = pnand %p902_p7, %p896_p12 }
  0xce   : > { %v337_v4 = vpop.xlane.xlu0 %336 }
  0xcf   : > { %v342_v5 = vmul.f32 0.03125, %v337_v4 }
  0xd1   : > { %v344_v6 = vsub.f32 %v330_v0, %v342_v5 }
  0xd2   : > { %v340_v7 = vpop.xlane.xlu0 %339 }
  0xd3   : > { %v343_v8 = vmul.f32 0.03125, %v340_v7  ;;  %v346_v9 = vmul.f32 %v344_v6, %v344_v6 }
  0xd5   : > { %v345_v10 = vsub.f32 %v331_v1, %v343_v8  ;;  %v348_v11 = vsel %vm334_vm0, %v346_v9, 0.0 }
  0xd6   : > { %349 = vadd.xlane.f32.xlu1 %v348_v11 }
  0xd7   : > { %v347_v12 = vmul.f32 %v345_v10, %v345_v10 }
  0xd9   : > { %v351_v13 = vsel %vm334_vm0, %v347_v12, 0.0 }
  0xda   : > { %352 = vadd.xlane.f32.xlu1 %v351_v13 }
 0x15f   : > { %v350_v17 = vpop.xlane.xlu1 %349 }
 0x160   : > { %v354_v18 = vmul.f32 0.03125, %v350_v17 }
 0x162   : > { %v356_v19 = vadd.f32 1e-05, %v354_v18 }
 0x163   : > { %v353_v20 = vpop.xlane.xlu1 %352 }
 0x164   : > { %835 = vrsqrt.f32 %v356_v19  ;;  %v355_v21 = vmul.f32 0.03125, %v353_v20 }
 0x166   : > { %v357_v22 = vadd.f32 1e-05, %v355_v21 }
 0x168   : > { %837 = vrsqrt.f32 %v357_v22 }
 0x171   : > { %v836_v23 = vpop.eup %835 }
 0x172   : > { %v360_v24 = vmul.f32 %v836_v23, %v344_v6 }
 0x174   : > { %v368_v28 = vmul.f32 %v706_v25, %v360_v24 }
 0x175   : > { %v838_v26 = vpop.eup %837 }
 0x176   : > { %v361_v27 = vmul.f32 %v838_v26, %v345_v10  ;;  %v376_v31 = vadd.f32 %v707_v29, %v368_v28 }
 0x178   : > { %v369_v30 = vmul.f32 %v706_v25, %v361_v27 }
 0x17a   : > { %v377_v32 = vadd.f32 %v707_v29, %v369_v30 }
 0x17c   : > { %v378_v33 = vpack.c.bf16 %v377_v32, %v376_v31 }
 0x17e   : > { %738 = vmatmul.mubr.msk.bf16.vlgmr.msra.gmra.mxu0 %vm334_vm0, %v378_v33 }
 0x23e   : > { %v432_v34 = vpop.f32.mrf.mxu0 }
 0x23f   : > { %v725_v35 = vpack.c.bf16 %v432_v34, %v432_v34 }
 0x240   : > { %v739_v36 = vpop.f32.mrf.mxu0 }
 0x241   : > { %448 = vst.msk [vmem:[%s310_s15] sm:$0xf] %vm447_vm2, %v725_v35  ;;  %458 = vrot.lane.b32.xlu1 %v725_v35, %s1043_s17  ;;  %450 = vrot.lane.b32.xlu0 %v725_v35, %s1044_s12 }
 0x242   : > { %v435_v37 = vpop.f32.mrf.mxu0 }
 0x243   : > { %v726_v38 = vpack.c.bf16 %v435_v37, %v435_v37 }
 0x244   : > { %v740_v39 = vpop.f32.mrf.mxu0 }
 0x245   : > { %449 = vst.msk [vmem:[%s310_s15 + $0x4] sm:$0xf] %vm447_vm2, %v726_v38  ;;  %452 = vrot.lane.b32.xlu1 %v726_v38, %s1044_s12 }
 0x246   : > { %906 = shalt.err (!%p903_p2)
}
 0x247   : > { %s907_s29 = scalar_lea.hbm %s1235_s24, 128  ;;  %s911_s12 = scalar_lea.hbm %s1374_s4, 256 }
 0x248   : > { %p908_p6 = scmp.ne.s32.totalorder %s1235_s24, %s907_s29  ;;  %p912_p11 = scmp.lt.s32.totalorder %s1235_s24, %s1374_s4 }
 0x249   : > { %p913_p1 = scmp.lt.s32.totalorder %s911_s12, %s907_s29 }
 0x24a   : > { %p909_p9 = pnand %p908_p6, %p1169_p0 }
 0x24b   : > { %p914_p10 = por %p913_p1, %p912_p11 }
 0x24c   : > { %p910_p13 = pneg %p909_p9 }
 0x24e   : > { %p915_p4 = pnand %p914_p10, %p910_p13 }
 0x250   : > { %918 = shalt.err (!%p915_p4)
}
 0x251   : > { %s1046_s25 = smov 4   ;;  %460 = vrot.lane.b32.xlu1 %v726_v38, %s1043_s17  ;;  %s317_s14 = scalar_lea.vmem [#allocation8], %s1221_s11 }
 0x252   : > { %747 = dma.vmem_to_hbm [thread:$0]  (%p1169_p0), %s1229_s16, 128, %s1235_s24, %s467_s13, %s1043_s17, %s1043_s17, %s1046_s25  }
 0x253   : > { %s510_s3 = sshll.u32 %s317_s14, 4  ;;  %s471_s28 = sand.u32 1, %s1115_s27   ;;  %s1273_s3 = int_to_ptr.vmem [resolvable:$true] %s510_s3 }
 0x254   : > { %s1268_s29 = scalar_lea.vmem [#allocation10], %s1221_s11  ;;  %s1279_s24 = scalar_lea.hbm %s1375_s5, %s1225_s20 }
 0x255   : > { %s528_s13 = sshll.u32 %s1268_s29, 4  ;;  %s1283_s27 = scalar_lea.sflag [#allocation9], %s471_s28  ;;  %s1311_s13 = int_to_ptr.vmem [resolvable:$true] %s528_s13 }
 0x256   : > { %s919_s11 = scalar_lea.vmem %s1273_s3, 128  ;;  %s1047_s7 = smov [#allocation8]  }
 0x257   : > { %p920_p8 = scmp.ne.s32.totalorder %s1273_s3, %s919_s11  ;;  %s923_s15 = sshll.u32 %s1047_s7, 4  ;;  %s924_s15 = int_to_ptr.vmem [resolvable:$false] %s923_s15 }
 0x258   : > { %s925_s12 = scalar_lea.vmem %s924_s15, 256  ;;  %p926_p5 = scmp.lt.s32.totalorder %s1273_s3, %s924_s15 }
 0x259   : > { %p921_p12 = pnand %p920_p8, %p1169_p0  ;;  %p927_p7 = scmp.lt.s32.totalorder %s925_s12, %s919_s11 }
 0x25b   : > { %p922_p3 = pneg %p921_p12  ;;  %p928_p2 = por %p927_p7, %p926_p5 }
 0x25d   : > { %p929_p6 = pnand %p928_p2, %p922_p3 }
 0x2b3   : > { %v459_v40 = vpop.permute.xlu1 %458  ;;  %v451_v41 = vpop.permute.xlu0 %450 }
 0x2b4   : > { %464 = vst.msk [vmem:[%s1268_s29] sm:$0xf] %vm447_vm2, %v459_v40  ;;  %456 = vst.msk [vmem:[%s317_s14] sm:$0xf] %vm447_vm2, %v451_v41 }
 0x2b7   : > { %v453_v42 = vpop.permute.xlu1 %452 }
 0x2b8   : > { %457 = vst.msk [vmem:[%s317_s14 + $0x4] sm:$0xf] %vm447_vm2, %v453_v42 }
 0x2b9   : > { %932 = shalt.err (!%p929_p6)
}
 0x2ba   : > { %s933_s18 = scalar_lea.hbm %s1279_s24, 128  ;;  %s937_s28 = scalar_lea.hbm %s1375_s5, 256 }
 0x2bb   : > { %p934_p9 = scmp.ne.s32.totalorder %s1279_s24, %s933_s18  ;;  %p938_p1 = scmp.lt.s32.totalorder %s1279_s24, %s1375_s5 }
 0x2bc   : > { %p939_p10 = scmp.lt.s32.totalorder %s937_s28, %s933_s18 }
 0x2bd   : > { %p935_p13 = pnand %p934_p9, %p1169_p0 }
 0x2be   : > { %p940_p4 = por %p939_p10, %p938_p1 }
 0x2bf   : > { %p936_p11 = pneg %p935_p13 }
 0x2c1   : > { %p941_p8 = pnand %p940_p4, %p936_p11 }
 0x2c3   : > { %944 = shalt.err (!%p941_p8)
}
 0x2c4   : > { %748 = dma.vmem_to_hbm [thread:$0]  (%p1169_p0), %s1273_s3, 128, %s1279_s24, %s1283_s27, %s1043_s17, %s1043_s17, %s1046_s25   ;;  %v461_v43 = vpop.permute.xlu1 %460 }
 0x2c5   : > { %s1317_s15 = scalar_lea.hbm %s1376_s6, %s1225_s20  ;;  %465 = vst.msk [vmem:[%s1268_s29 + $0x4] sm:$0xf] %vm447_vm2, %v461_v43  ;;  %s945_s12 = scalar_lea.vmem %s1311_s13, 128 }
 0x2c6   : > { %p946_p12 = scmp.ne.s32.totalorder %s1311_s13, %s945_s12  ;;  %s1048_s3 = smov [#allocation10]  }
 0x2c7   : > { %s949_s24 = sshll.u32 %s1048_s3, 4  ;;  %s950_s24 = int_to_ptr.vmem [resolvable:$false] %s949_s24 }
 0x2c8   : > { %p947_p3 = pnand %p946_p12, %p1169_p0  ;;  %s951_s18 = scalar_lea.vmem %s950_s24, 256 }
 0x2c9   : > { %p952_p7 = scmp.lt.s32.totalorder %s1311_s13, %s950_s24  ;;  %p953_p2 = scmp.lt.s32.totalorder %s951_s18, %s945_s12 }
 0x2ca   : > { %p948_p5 = pneg %p947_p3 }
 0x2cb   : > { %p954_p6 = por %p953_p2, %p952_p7 }
 0x2cd   : > { %p955_p9 = pnand %p954_p6, %p948_p5 }
 0x2cf   : > { %958 = shalt.err (!%p955_p9)
}
 0x2d0   : > { %s959_s20 = scalar_lea.hbm %s1317_s15, 128  ;;  %s963_s14 = scalar_lea.hbm %s1376_s6, 256 }
 0x2d1   : > { %p960_p13 = scmp.ne.s32.totalorder %s1317_s15, %s959_s20  ;;  %p964_p10 = scmp.lt.s32.totalorder %s1317_s15, %s1376_s6 }
 0x2d2   : > { %p965_p4 = scmp.lt.s32.totalorder %s963_s14, %s959_s20 }
 0x2d3   : > { %p961_p11 = pnand %p960_p13, %p1169_p0 }
 0x2d4   : > { %p966_p8 = por %p965_p4, %p964_p10 }
 0x2d5   : > { %p962_p1 = pneg %p961_p11 }
 0x2d7   : > { %p967_p12 = pnand %p966_p8, %p962_p1 }
 0x2d9   : > { %970 = shalt.err (!%p967_p12)
}
 0x2da   : > { %749 = dma.vmem_to_hbm [thread:$0]  (%p1169_p0), %s1311_s13, 128, %s1317_s15, %s1283_s27, %s1043_s17, %s1043_s17, %s1046_s25  }
 0x2db PF: > { %s543_s16 = sand.u32 1, %s1013_s21   ;;  %p1395_p3 = scmp.ne.s32.totalorder %s1384_s30, 0 }
 0x2dc   : > { %p1396_p5 = scmp.ge.s32.totalorder %s1033_s26, 2  ;;  %s544_s11 = scalar_lea.sflag [#allocation4], %s543_s16 }
 0x2de   : > { %p762_p7 = pnand %p1396_p5, %p1395_p3 }
 0x2e0   : > { %p763_p2 = pneg %p762_p7 }
 0x2e2   : > { %1004 = dma.done.wait (%p763_p2), %s544_s11, 128  }
 0x2e3   : > { %1006 = vsyncadd (%p763_p2), %s544_s11, 4294967168  ;;  %s1397_s19 = sadd.s32 4294967294, %s1033_s26  }
 0x2e4   : > { %s552_s7 = sand.u32 1, %s1397_s19  }
 0x2e5   : > { %s553_s12 = scalar_lea.sflag [#allocation9], %s552_s7 }
 0x2e6   : > { %1008 = dma.done.wait (%p763_p2), %s553_s12, 256  }
 0x2e7   : > { %1010 = vsyncadd (%p763_p2), %s553_s12, 4294967040  ;;  %s27_s26 = sadd.s32 1, %s1033_s26   ;;  %s1398_s24 = sld [smem:[#allocation15_spill]] }
 0x2e8   : > { %p24_p0 = scmp.ge.s32.totalorder %s27_s26, 4   ;;  %s1399_s25 = sld [smem:[#allocation16_spill]] }
 0x2e9   : > { %s1400_s21 = smov %s1017_s22  ;;  %s1401_s22 = smov %s1021_s23 }
 0x2ea   : > { %s1402_s23 = smov %s1178_s10  ;;  %26 = sbr.rel (!%p24_p0) target bundleno = 11 (0xb), region = 117 }
 0x2ef   :  { %567 = vsyncpa [#allocation3], 1 }
 0x2f0   :  { %569 = vsyncpa [#allocation3 + $0x1], 1 }
 0x2f1   :  { %570 = vsyncpa [#allocation6], 1 }
 0x2f2   :  { %571 = vsyncpa [#allocation4], 1 }
 0x2f3   :  { %573 = vsyncpa [#allocation4 + $0x1], 1 }
 0x2f4   :  { %574 = vsyncpa [#allocation9], 1 }
 0x2f5   :  { %576 = vsyncpa [#allocation9 + $0x1], 1 }

</bundles_post_ra>
